<compile_context>
chip_gen: v7x
topology: tpu7x:2x2x1
jax: 0.10.0
libtpu: 0.0.40
codegen_flags: <defaults>
</compile_context>

<pallas_src>
import functools

import numpy as np
import jax
import jax.numpy as jnp
from jax import lax
from jax.experimental import pallas as pl
from jax.experimental.pallas import tpu as pltpu

_LANE = 128
_SUB = 8


def _round_up(x, m):
    return ((x + m - 1) // m) * m


# ------------------------- Pallas kernel -------------------------

def _nms_kernel(x_ref, o_ref, *, nc, conf_thres, iou_thres, max_det, max_wh):
    """Greedy class-aware NMS for ONE image.

    x_ref : (Cpad, Bpad) f32 — rows 0..3 = cx,cy,w,h ; row 4 = objectness ;
            rows 5..5+nc-1 = class probabilities ; boxes along the lane axis.
    o_ref : (8, max_det) f32 — column k = [x1,y1,x2,y2,conf,cls,0,0] of the
            k-th kept detection; columns past the valid count are all zero.
    """
    f32 = jnp.float32
    Bpad = x_ref.shape[1]

    cx = x_ref[0:1, :]
    cy = x_ref[1:2, :]
    w = x_ref[2:3, :]
    h = x_ref[3:4, :]
    obj = x_ref[4:5, :]

    # Best class (prob + index): statically unrolled loop over the nc rows
    # (first index wins on ties, matching torch .max()).
    best_p = x_ref[5:6, :]
    best_j = jnp.zeros_like(best_p)
    for j in range(1, nc):
        p = x_ref[5 + j:6 + j, :]
        better = p > best_p
        best_p = jnp.where(better, p, best_p)
        best_j = jnp.where(better, f32(j), best_j)

    conf = obj * best_p
    # Below-threshold boxes (and the zero-padded lanes, whose conf is 0) get a
    # score of -1 so they can never be selected.
    scores = jnp.where(conf > conf_thres, conf, f32(-1.0))

    # xywh -> xyxy; class offset so boxes of different classes never overlap.
    x1 = cx - w * 0.5
    y1 = cy - h * 0.5
    x2 = cx + w * 0.5
    y2 = cy + h * 0.5
    off = best_j * f32(max_wh)
    ox1 = x1 + off
    oy1 = y1 + off
    ox2 = x2 + off
    oy2 = y2 + off
    areas = (ox2 - ox1) * (oy2 - oy1)

    zero = jnp.zeros_like(cx)
    # 16-row gather table: one lane-masked reduce per selection step extracts
    # everything the loop body needs about the chosen box.
    #   rows 0..7  : output column (x1,y1,x2,y2,conf,cls,0,0)
    #   rows 8..11 : class-offset coords (for IoU)
    #   row  12    : area ; rows 13..15 padding
    table = jnp.concatenate(
        [x1, y1, x2, y2, conf, best_j, zero, zero,
         ox1, oy1, ox2, oy2, areas, zero, zero, zero], axis=0)

    lane_iota = lax.broadcasted_iota(jnp.int32, (1, Bpad), 1)
    out_iota = lax.broadcasted_iota(jnp.int32, (8, max_det), 1)
    out0 = jnp.zeros((8, max_det), f32)

    def body(k, carry):
        sc, out = carry
        best = jnp.max(sc, axis=1, keepdims=True)                     # (1,1)
        valid = best > f32(0.0)                                       # (1,1)
        idx = jnp.min(jnp.where(sc == best, lane_iota, Bpad),
                      axis=1, keepdims=True)                          # (1,1)
        sel = lane_iota == idx                                        # (1,Bpad)

        picked = jnp.sum(jnp.where(sel, table, f32(0.0)),
                         axis=1, keepdims=True)                       # (16,1)
        sx1, sy1 = picked[8:9, :], picked[9:10, :]
        sx2, sy2 = picked[10:11, :], picked[11:12, :]
        sarea = picked[12:13, :]

        # IoU of the selected box against every box (class-offset coords).
        iw = jnp.maximum(jnp.minimum(ox2, sx2) - jnp.maximum(ox1, sx1), 0.0)
        ih = jnp.maximum(jnp.minimum(oy2, sy2) - jnp.maximum(oy1, sy1), 0.0)
        inter = iw * ih
        union = jnp.maximum(sarea + areas - inter, f32(1e-9))
        iou = inter / union

        # Suppress overlapping boxes and (always) the selected box itself.
        suppress = jnp.logical_and(valid,
                                   jnp.logical_or(iou > iou_thres, sel))
        sc = jnp.where(suppress, f32(-1.0), sc)

        col = jnp.where(valid, picked[0:8, :], f32(0.0))              # (8,1)
        out = jnp.where(out_iota == k, col, out)
        return sc, out

    _, out = lax.fori_loop(0, max_det, body, (scores, out0))
    o_ref[...] = out.astype(o_ref.dtype)


def _nms_pallas(pred_cb, *, nc, conf_thres, iou_thres, max_det, max_wh):
    """pred_cb: (N, Cpad, Bpad) f32, fields x boxes. Returns (N, 8, max_det)."""
    N, Cpad, Bpad = pred_cb.shape
    kernel = functools.partial(_nms_kernel, nc=nc, conf_thres=conf_thres,
                               iou_thres=iou_thres, max_det=max_det,
                               max_wh=max_wh)
    return pl.pallas_call(
        kernel,
        out_shape=jax.ShapeDtypeStruct((N, 8, max_det), jnp.float32),
        grid=(N,),
        in_specs=[pl.BlockSpec((None, Cpad, Bpad), lambda n: (n, 0, 0))],
        out_specs=pl.BlockSpec((None, 8, max_det), lambda n: (n, 0, 0)),
        compiler_params=pltpu.CompilerParams(
            dimension_semantics=("parallel",)),
    )(pred_cb)


# ------------------------- module -------------------------

class NMSPallas:
    """Pallas equivalent of models.common.NMS (fixed-shape padded output)."""

    conf = 0.25
    iou = 0.45
    classes = None      # TODO(synk): class filtering not implemented (default None)
    max_wh = 4096.0

    def __init__(self, max_det=32):
        self.max_det = int(max_det)

    def __call__(self, x):
        pred = x[0]                              # (N, B, 5+nc), like the spec
        N, B, C = pred.shape
        nc = C - 5
        Cpad = _round_up(C, _SUB)
        Bpad = _round_up(B, _LANE)
        # Boxes on the lane axis (128-aligned), fields on the sublane axis.
        p = jnp.transpose(pred, (0, 2, 1)).astype(jnp.float32)       # (N,C,B)
        p = jnp.pad(p, ((0, 0), (0, Cpad - C), (0, Bpad - B)))
        out = _nms_pallas(p, nc=nc, conf_thres=float(self.conf),
                          iou_thres=float(self.iou), max_det=self.max_det,
                          max_wh=float(self.max_wh))
        dets = jnp.transpose(out, (0, 2, 1))[:, :, :6]     # (N, max_det, 6)
        counts = jnp.sum(dets[:, :, 4] > 0.0, axis=-1).astype(jnp.int32)
        return dets, counts


# ------------------------- reference (numpy) -------------------------

def _nms_reference(pred, conf_thres, iou_thres, max_det, max_wh):
    pred = np.asarray(pred, dtype=np.float32)
    N, B, C = pred.shape
    nc = C - 5
    dets = np.zeros((N, max_det, 6), np.float32)
    counts = np.zeros((N,), np.int32)
    for n in range(N):
        p = pred[n]
        obj = p[:, 4]
        clsp = p[:, 5:5 + nc]
        j = clsp.argmax(1)
        maxp = clsp[np.arange(B), j]
        conf = obj * maxp
        boxes = np.stack([p[:, 0] - p[:, 2] * 0.5,
                          p[:, 1] - p[:, 3] * 0.5,
                          p[:, 0] + p[:, 2] * 0.5,
                          p[:, 1] + p[:, 3] * 0.5], axis=1)
        oboxes = boxes + (j.astype(np.float32) * max_wh)[:, None]
        areas = (oboxes[:, 2] - oboxes[:, 0]) * (oboxes[:, 3] - oboxes[:, 1])
        cand = np.where(conf > conf_thres)[0]
        cand = cand[np.argsort(-conf[cand], kind="stable")]
        k = 0
        while cand.size and k < max_det:
            i = cand[0]
            dets[n, k, :4] = boxes[i]
            dets[n, k, 4] = conf[i]
            dets[n, k, 5] = float(j[i])
            k += 1
            rest = cand[1:]
            bi, br = oboxes[i], oboxes[rest]
            iw = np.maximum(np.minimum(bi[2], br[:, 2]) -
                            np.maximum(bi[0], br[:, 0]), 0.0)
            ih = np.maximum(np.minimum(bi[3], br[:, 3]) -
                            np.maximum(bi[1], br[:, 1]), 0.0)
            inter = iw * ih
            union = np.maximum(areas[i] + areas[rest] - inter, 1e-9)
            iou = inter / union
            cand = rest[iou <= iou_thres]
        counts[n] = k
    return dets, counts


if __name__ == "__main__":
    key = jax.random.PRNGKey(0)
    kxy, kwh, kobj, kcls = jax.random.split(key, 4)
    N, B, nc = 2, 256, 3
    # Synthetic Detect-layer output: (N, B, 5+nc) = [cx, cy, w, h, obj, cls...]
    cxcy = jax.random.uniform(kxy, (N, B, 2), jnp.float32, 0.0, 160.0)
    wh = jax.random.uniform(kwh, (N, B, 2), jnp.float32, 20.0, 120.0)
    obj = jax.random.uniform(kobj, (N, B, 1), jnp.float32, 0.0, 1.0)
    obj = obj * jnp.array([1.0, 0.35], jnp.float32).reshape(N, 1, 1)
    clsp = jax.random.uniform(kcls, (N, B, nc), jnp.float32, 0.0, 1.0)
    pred = jnp.concatenate([cxcy, wh, obj, clsp], axis=-1)

    mod = NMSPallas(max_det=32)
    dets, counts = mod((pred,))                  # spec forward uses x[0]
    dets = jax.block_until_ready(dets)
    counts = jax.block_until_ready(counts)

    ref_dets, ref_counts = _nms_reference(np.asarray(pred), mod.conf, mod.iou,
                                          mod.max_det, mod.max_wh)
    np.testing.assert_array_equal(np.asarray(counts), ref_counts)
    np.testing.assert_allclose(np.asarray(dets), ref_dets, atol=1e-4, rtol=1e-4)

    print("KERNEL_OK")
</pallas_src>

<mosaic_0001>
module attributes {stable_mosaic.version = 11 : i64} {
  func.func @_nms_kernel(%arg0: i32, %arg1: memref<1x8x256xf32, #tpu.memory_space<vmem>>, %arg2: memref<1x8x32xf32, #tpu.memory_space<vmem>>) attributes {dimension_semantics = [#tpu.dimension_semantics<parallel>], iteration_bounds = array<i64: 2>, scalar_prefetch = 0 : i64, scratch_operands = 0 : i64, tpu.core_type = #tpu.core_type<tc>, window_params = [{transform_indices = @transform_0, window_bounds = array<i64: 1, 8, 256>}, {transform_indices = @transform_1, window_bounds = array<i64: 1, 8, 32>}]} {
    %c0 = arith.constant 0 : index
    %c0_0 = arith.constant 0 : index
    %c0_1 = arith.constant 0 : index
    %0 = vector.load %arg1[%c0, %c0_0, %c0_1] : memref<1x8x256xf32, #tpu.memory_space<vmem>>, vector<1x1x256xf32>
    %1 = vector.shape_cast %0 : vector<1x1x256xf32> to vector<1x256xf32>
    %c0_2 = arith.constant 0 : index
    %c1 = arith.constant 1 : index
    %c0_3 = arith.constant 0 : index
    %2 = vector.load %arg1[%c0_2, %c1, %c0_3] : memref<1x8x256xf32, #tpu.memory_space<vmem>>, vector<1x1x256xf32>
    %3 = vector.shape_cast %2 : vector<1x1x256xf32> to vector<1x256xf32>
    %c0_4 = arith.constant 0 : index
    %c2 = arith.constant 2 : index
    %c0_5 = arith.constant 0 : index
    %4 = vector.load %arg1[%c0_4, %c2, %c0_5] : memref<1x8x256xf32, #tpu.memory_space<vmem>>, vector<1x1x256xf32>
    %5 = vector.shape_cast %4 : vector<1x1x256xf32> to vector<1x256xf32>
    %c0_6 = arith.constant 0 : index
    %c3 = arith.constant 3 : index
    %c0_7 = arith.constant 0 : index
    %6 = vector.load %arg1[%c0_6, %c3, %c0_7] : memref<1x8x256xf32, #tpu.memory_space<vmem>>, vector<1x1x256xf32>
    %7 = vector.shape_cast %6 : vector<1x1x256xf32> to vector<1x256xf32>
    %c0_8 = arith.constant 0 : index
    %c4 = arith.constant 4 : index
    %c0_9 = arith.constant 0 : index
    %8 = vector.load %arg1[%c0_8, %c4, %c0_9] : memref<1x8x256xf32, #tpu.memory_space<vmem>>, vector<1x1x256xf32>
    %9 = vector.shape_cast %8 : vector<1x1x256xf32> to vector<1x256xf32>
    %c0_10 = arith.constant 0 : index
    %c5 = arith.constant 5 : index
    %c0_11 = arith.constant 0 : index
    %10 = vector.load %arg1[%c0_10, %c5, %c0_11] : memref<1x8x256xf32, #tpu.memory_space<vmem>>, vector<1x1x256xf32>
    %11 = vector.shape_cast %10 : vector<1x1x256xf32> to vector<1x256xf32>
    %cst = arith.constant 0.000000e+00 : f32
    %12 = vector.broadcast %cst : f32 to vector<1x256xf32>
    %c0_12 = arith.constant 0 : index
    %c6 = arith.constant 6 : index
    %c0_13 = arith.constant 0 : index
    %13 = vector.load %arg1[%c0_12, %c6, %c0_13] : memref<1x8x256xf32, #tpu.memory_space<vmem>>, vector<1x1x256xf32>
    %14 = vector.shape_cast %13 : vector<1x1x256xf32> to vector<1x256xf32>
    %15 = arith.cmpf ogt, %14, %11 : vector<1x256xf32>
    %16 = arith.select %15, %14, %11 : vector<1x256xi1>, vector<1x256xf32>
    %cst_14 = arith.constant 1.000000e+00 : f32
    %17 = vector.broadcast %cst_14 : f32 to vector<1x256xf32>
    %18 = arith.select %15, %17, %12 : vector<1x256xi1>, vector<1x256xf32>
    %c0_15 = arith.constant 0 : index
    %c7 = arith.constant 7 : index
    %c0_16 = arith.constant 0 : index
    %19 = vector.load %arg1[%c0_15, %c7, %c0_16] : memref<1x8x256xf32, #tpu.memory_space<vmem>>, vector<1x1x256xf32>
    %20 = vector.shape_cast %19 : vector<1x1x256xf32> to vector<1x256xf32>
    %21 = arith.cmpf ogt, %20, %16 : vector<1x256xf32>
    %22 = arith.select %21, %20, %16 : vector<1x256xi1>, vector<1x256xf32>
    %cst_17 = arith.constant 2.000000e+00 : f32
    %23 = vector.broadcast %cst_17 : f32 to vector<1x256xf32>
    %24 = arith.select %21, %23, %18 : vector<1x256xi1>, vector<1x256xf32>
    %25 = arith.mulf %9, %22 : vector<1x256xf32>
    %cst_18 = arith.constant 2.500000e-01 : f32
    %26 = vector.broadcast %cst_18 : f32 to vector<1x256xf32>
    %27 = arith.cmpf ogt, %25, %26 : vector<1x256xf32>
    %cst_19 = arith.constant -1.000000e+00 : f32
    %28 = vector.broadcast %cst_19 : f32 to vector<1x256xf32>
    %29 = arith.select %27, %25, %28 : vector<1x256xi1>, vector<1x256xf32>
    %cst_20 = arith.constant 5.000000e-01 : f32
    %30 = vector.broadcast %cst_20 : f32 to vector<1x256xf32>
    %31 = arith.mulf %5, %30 : vector<1x256xf32>
    %32 = arith.subf %1, %31 : vector<1x256xf32>
    %cst_21 = arith.constant 5.000000e-01 : f32
    %33 = vector.broadcast %cst_21 : f32 to vector<1x256xf32>
    %34 = arith.mulf %7, %33 : vector<1x256xf32>
    %35 = arith.subf %3, %34 : vector<1x256xf32>
    %cst_22 = arith.constant 5.000000e-01 : f32
    %36 = vector.broadcast %cst_22 : f32 to vector<1x256xf32>
    %37 = arith.mulf %5, %36 : vector<1x256xf32>
    %38 = arith.addf %1, %37 : vector<1x256xf32>
    %cst_23 = arith.constant 5.000000e-01 : f32
    %39 = vector.broadcast %cst_23 : f32 to vector<1x256xf32>
    %40 = arith.mulf %7, %39 : vector<1x256xf32>
    %41 = arith.addf %3, %40 : vector<1x256xf32>
    %cst_24 = arith.constant 4.096000e+03 : f32
    %42 = vector.broadcast %cst_24 : f32 to vector<1x256xf32>
    %43 = arith.mulf %24, %42 : vector<1x256xf32>
    %44 = arith.addf %32, %43 : vector<1x256xf32>
    %45 = arith.addf %35, %43 : vector<1x256xf32>
    %46 = arith.addf %38, %43 : vector<1x256xf32>
    %47 = arith.addf %41, %43 : vector<1x256xf32>
    %48 = arith.subf %46, %44 : vector<1x256xf32>
    %49 = arith.subf %47, %45 : vector<1x256xf32>
    %50 = arith.mulf %48, %49 : vector<1x256xf32>
    %cst_25 = arith.constant 0.000000e+00 : f32
    %51 = vector.broadcast %cst_25 : f32 to vector<1x256xf32>
    %52 = tpu.concatenate %32, %35, %38, %41, %25, %24, %51, %51, %44, %45, %46, %47, %50, %51, %51, %51 in 0 : vector<1x256xf32>, vector<1x256xf32>, vector<1x256xf32>, vector<1x256xf32>, vector<1x256xf32>, vector<1x256xf32>, vector<1x256xf32>, vector<1x256xf32>, vector<1x256xf32>, vector<1x256xf32>, vector<1x256xf32>, vector<1x256xf32>, vector<1x256xf32>, vector<1x256xf32>, vector<1x256xf32>, vector<1x256xf32> -> vector<16x256xf32>
    %53 = tpu.iota {dimensions = array<i32: 1>} : vector<1x256xi32>
    %54 = tpu.iota {dimensions = array<i32: 1>} : vector<8x32xi32>
    %cst_26 = arith.constant 0.000000e+00 : f32
    %55 = vector.broadcast %cst_26 : f32 to vector<8x32xf32>
    %c0_i32 = arith.constant 0 : i32
    %c32_i32 = arith.constant 32 : i32
    %56 = arith.addi %c0_i32, %c32_i32 : i32
    %c1_i32 = arith.constant 1 : i32
    %57:2 = scf.for %arg3 = %c0_i32 to %56 step %c1_i32 iter_args(%arg4 = %29, %arg5 = %55) -> (vector<1x256xf32>, vector<8x32xf32>)  : i32 {
      %cst_31 = arith.constant dense<0xFF800000> : vector<1xf32>
      %61 = vector.multi_reduction <maximumf>, %arg4, %cst_31 [1] : vector<1x256xf32> to vector<1xf32>
      %62 = vector.shape_cast %61 : vector<1xf32> to vector<1x1xf32>
      %cst_32 = arith.constant 0.000000e+00 : f32
      %63 = vector.broadcast %cst_32 : f32 to vector<1x1xf32>
      %64 = arith.cmpf ogt, %62, %63 : vector<1x1xf32>
      %65 = vector.broadcast %62 : vector<1x1xf32> to vector<1x256xf32>
      %66 = arith.cmpf oeq, %arg4, %65 : vector<1x256xf32>
      %c256_i32 = arith.constant 256 : i32
      %67 = vector.broadcast %c256_i32 : i32 to vector<1x256xi32>
      %68 = arith.select %66, %53, %67 : vector<1x256xi1>, vector<1x256xi32>
      %cst_33 = arith.constant dense<2147483647> : vector<1xi32>
      %69 = vector.multi_reduction <minsi>, %68, %cst_33 [1] : vector<1x256xi32> to vector<1xi32>
      %70 = vector.shape_cast %69 : vector<1xi32> to vector<1x1xi32>
      %71 = vector.broadcast %70 : vector<1x1xi32> to vector<1x256xi32>
      %72 = arith.cmpi eq, %53, %71 : vector<1x256xi32>
      %cst_34 = arith.constant 0.000000e+00 : f32
      %73 = vector.shape_cast %72 : vector<1x256xi1> to vector<1x256xi1>
      %74 = vector.broadcast %73 : vector<1x256xi1> to vector<16x256xi1>
      %75 = vector.broadcast %cst_34 : f32 to vector<16x256xf32>
      %76 = arith.select %74, %52, %75 : vector<16x256xi1>, vector<16x256xf32>
      %cst_35 = arith.constant dense<0.000000e+00> : vector<16xf32>
      %77 = vector.multi_reduction <add>, %76, %cst_35 [1] : vector<16x256xf32> to vector<16xf32>
      %78 = vector.shape_cast %77 : vector<16xf32> to vector<16x1xf32>
      %79 = vector.extract_strided_slice %78 {offsets = [8, 0], sizes = [1, 1], strides = [1, 1]} : vector<16x1xf32> to vector<1x1xf32>
      %80 = vector.extract_strided_slice %78 {offsets = [9, 0], sizes = [1, 1], strides = [1, 1]} : vector<16x1xf32> to vector<1x1xf32>
      %81 = vector.extract_strided_slice %78 {offsets = [10, 0], sizes = [1, 1], strides = [1, 1]} : vector<16x1xf32> to vector<1x1xf32>
      %82 = vector.extract_strided_slice %78 {offsets = [11, 0], sizes = [1, 1], strides = [1, 1]} : vector<16x1xf32> to vector<1x1xf32>
      %83 = vector.extract_strided_slice %78 {offsets = [12, 0], sizes = [1, 1], strides = [1, 1]} : vector<16x1xf32> to vector<1x1xf32>
      %84 = vector.broadcast %81 : vector<1x1xf32> to vector<1x256xf32>
      %85 = arith.minimumf %46, %84 : vector<1x256xf32>
      %86 = vector.broadcast %79 : vector<1x1xf32> to vector<1x256xf32>
      %87 = arith.maximumf %44, %86 : vector<1x256xf32>
      %88 = arith.subf %85, %87 : vector<1x256xf32>
      %cst_36 = arith.constant 0.000000e+00 : f32
      %89 = vector.broadcast %cst_36 : f32 to vector<1x256xf32>
      %90 = arith.maximumf %88, %89 : vector<1x256xf32>
      %91 = vector.broadcast %82 : vector<1x1xf32> to vector<1x256xf32>
      %92 = arith.minimumf %47, %91 : vector<1x256xf32>
      %93 = vector.broadcast %80 : vector<1x1xf32> to vector<1x256xf32>
      %94 = arith.maximumf %45, %93 : vector<1x256xf32>
      %95 = arith.subf %92, %94 : vector<1x256xf32>
      %cst_37 = arith.constant 0.000000e+00 : f32
      %96 = vector.broadcast %cst_37 : f32 to vector<1x256xf32>
      %97 = arith.maximumf %95, %96 : vector<1x256xf32>
      %98 = arith.mulf %90, %97 : vector<1x256xf32>
      %99 = vector.broadcast %83 : vector<1x1xf32> to vector<1x256xf32>
      %100 = arith.addf %99, %50 : vector<1x256xf32>
      %101 = arith.subf %100, %98 : vector<1x256xf32>
      %cst_38 = arith.constant 9.99999971E-10 : f32
      %102 = vector.broadcast %cst_38 : f32 to vector<1x256xf32>
      %103 = arith.maximumf %101, %102 : vector<1x256xf32>
      %104 = arith.divf %98, %103 : vector<1x256xf32>
      %cst_39 = arith.constant 4.500000e-01 : f32
      %105 = vector.broadcast %cst_39 : f32 to vector<1x256xf32>
      %106 = arith.cmpf ogt, %104, %105 : vector<1x256xf32>
      %107 = arith.ori %106, %72 : vector<1x256xi1>
      %108 = vector.broadcast %64 : vector<1x1xi1> to vector<1x256xi1>
      %109 = arith.andi %108, %107 : vector<1x256xi1>
      %cst_40 = arith.constant -1.000000e+00 : f32
      %110 = vector.broadcast %cst_40 : f32 to vector<1x256xf32>
      %111 = arith.select %109, %110, %arg4 : vector<1x256xi1>, vector<1x256xf32>
      %112 = vector.extract_strided_slice %78 {offsets = [0, 0], sizes = [8, 1], strides = [1, 1]} : vector<16x1xf32> to vector<8x1xf32>
      %cst_41 = arith.constant 0.000000e+00 : f32
      %113 = vector.shape_cast %64 : vector<1x1xi1> to vector<1x1xi1>
      %114 = vector.broadcast %113 : vector<1x1xi1> to vector<8x1xi1>
      %115 = vector.broadcast %cst_41 : f32 to vector<8x1xf32>
      %116 = arith.select %114, %112, %115 : vector<8x1xi1>, vector<8x1xf32>
      %117 = vector.broadcast %arg3 : i32 to vector<8x32xi32>
      %118 = arith.cmpi eq, %54, %117 : vector<8x32xi32>
      %119 = vector.shape_cast %116 : vector<8x1xf32> to vector<8x1xf32>
      %120 = vector.broadcast %119 : vector<8x1xf32> to vector<8x32xf32>
      %121 = arith.select %118, %120, %arg5 : vector<8x32xi1>, vector<8x32xf32>
      scf.yield %111, %121 : vector<1x256xf32>, vector<8x32xf32>
    }
    %c32_i32_27 = arith.constant 32 : i32
    %c0_28 = arith.constant 0 : index
    %c0_29 = arith.constant 0 : index
    %c0_30 = arith.constant 0 : index
    %58 = vector.load %arg2[%c0_28, %c0_29, %c0_30] : memref<1x8x32xf32, #tpu.memory_space<vmem>>, vector<1x8x32xf32>
    %59 = vector.shape_cast %58 : vector<1x8x32xf32> to vector<8x32xf32>
    %60 = vector.shape_cast %57#1 : vector<8x32xf32> to vector<1x8x32xf32>
    tpu.vector_store %arg2[%c0_28, %c0_29, %c0_30], %60 {strides = array<i32>} : memref<1x8x32xf32, #tpu.memory_space<vmem>>, vector<1x8x32xf32>,
    return
  }
  func.func @transform_0(%arg0: i32) -> (i32, i32, i32) {
    %c0_i32 = arith.constant 0 : i32
    %c0_i32_0 = arith.constant 0 : i32
    %c0_i32_1 = arith.constant 0 : i32
    return %arg0, %c0_i32, %c0_i32_0 : i32, i32, i32
  }
  func.func @transform_1(%arg0: i32) -> (i32, i32, i32) {
    %c0_i32 = arith.constant 0 : i32
    %c0_i32_0 = arith.constant 0 : i32
    %c0_i32_1 = arith.constant 0 : i32
    return %arg0, %c0_i32, %c0_i32_0 : i32, i32, i32
  }
}

</mosaic_0001>

<bundles_post_ra>
// kernel: tpu_custom_call.1
= control target key start
LH: loop header
LB: loop body
LE: loop exit
PB: predicated region body
PF: predicated region fallthrough
CT: control target
= control target key end

     0   :  { %6 = vsyncpa [#allocation3], 0  ;;  %s1206_s0 = inlined_call_operand.hbm [shape: f32[2,8,256], index: 0, kind: input, shape index: {}]   ;;  %s1207_s1 = inlined_call_operand.hbm [shape: f32[2,8,32], index: 1, kind: output, shape index: {}]  }
   0x1   :  { %8 = vsyncpa [#allocation3 + $0x1], 0 }
   0x2   :  { %9 = vsyncpa [#allocation4], 0 }
   0x3   :  { %11 = vsyncpa [#allocation4 + $0x1], 0  ;;  %s862_s6 = smov 0   ;;  %s864_s7 = smov 0  }
   0x4   :  { %s866_s8 = smov 0   ;;  %s868_s9 = smov 0  }
   0x5 LB: > { %s883_s10 = sadd.s32 4294967295, %s829_s9   ;;  %s613_s11 = sadd.s32 4294967294, %s829_s9   ;;  %s829_s9 = sphi %s868_s9, %s1223_s9   ;;  %s825_s8 = sphi %s866_s8, %s1222_s8   ;;  %s821_s7 = sphi %s864_s7, %s1221_s7   ;;  %s817_s6 = sphi %s862_s6, %s1220_s6  }
   0x6   : > { %s887_s12 = sadd.s32 1, %s829_s9   ;;  %s24_s13 = sadd.s32 1, %s825_s8 }
   0x7   : > { %s21_s14 = ssub.s32 %s829_s9, %s887_s12  ;;  %p31_p0 = scmp.ne.s32.totalorder %s825_s8, %s821_s7 }
   0x8   : > { %p22_p1 = scmp.eq.s32.totalorder %s21_s14, 0  ;;  %p32_p2 = scmp.eq.s32.totalorder %s829_s9, 0 }
   0x9   : > { %p37_p3 = scmp.ne.s32.totalorder %s821_s7, %s817_s6  ;;  %p38_p4 = scmp.eq.s32.totalorder %s883_s10, 0 }
   0xa   : > { %s899_s15 = scalar_select %p22_p1, %s825_s8, %s24_s13  }
   0xb   : > { %p901_p5 = por %p32_p2, %p31_p0  ;;  %p905_p6 = por %p38_p4, %p37_p3 }
   0xc   : > { %p61_p7 = scmp.eq.s32.totalorder %s883_s10, 1  ;;  %p67_p8 = scmp.eq.s32.totalorder %s613_s11, 1 }
   0xd   : > { %p646_p10 = scmp.lt.s32.totalorder %s829_s9, 2  ;;  %s87_s20 = sand.u32 1, %s825_s8  }
   0xe   : > { %p912_p11 = por %p61_p7, %p31_p0  ;;  %p916_p12 = por %p67_p8, %p37_p3 }
   0xf   : > { %s633_s21 = sshll.u32 %s829_s9, 8  ;;  %s616_s22 = sshll.u32 %s87_s20, 4 }
  0x10   : > { %s1211_s18 = scalar_select %p912_p11, 1, 0 }
  0x11   : > { %s1212_s19 = scalar_select %p916_p12, 1, 0 }
  0x12   : > { %s925_s25 = scalar_lea.hbm %s1206_s0, %s633_s21  ;;  %s91_s26 = scalar_lea.vmem [#allocation2], %s616_s22 }
  0x13   : > { %s99_s27 = sshll.u32 %s91_s26, 4  ;;  %p929_p13 = pnand %p646_p10, %p901_p5  ;;  %s933_s27 = int_to_ptr.vmem [resolvable:$true] %s99_s27 }
  0x14   : > { %s88_s29 = scalar_lea.sflag [#allocation3], %s87_s20  ;;  %s717_s30 = scalar_lea.hbm %s925_s25, 256 }
  0x15   : > { %p718_p2 = scmp.ne.s32.totalorder %s925_s25, %s717_s30  ;;  %p719_p3 = pneg %p929_p13 }
  0x16   : > { %s722_s4 = scalar_lea.hbm %s1206_s0, 512  ;;  %p723_p5 = scmp.lt.u32.totalorder %s925_s25, %s1206_s0 }
  0x17   : > { %p720_p4 = pnand %p719_p3, %p718_p2  ;;  %p724_p8 = scmp.lt.u32.totalorder %s722_s4, %s717_s30 }
  0x18   : > { %p726_p9 = scmp.lt.u32.totalorder %s717_s30, %s925_s25 }
  0x19   : > { %p721_p7 = pneg %p720_p4  ;;  %p725_p10 = por %p724_p8, %p723_p5 }
  0x1b   : > { %p727_p0 = por %p726_p9, %p725_p10 }
  0x1d   : > { %p728_p1 = pnand %p727_p0, %p721_p7 }
  0x1f   : > { %731 = shalt.err (!%p728_p1)
}
  0x20   : > { %s732_s13 = scalar_lea.vmem %s933_s27, 256  ;;  %s847_s14 = smov [#allocation2]  }
  0x21   : > { %p733_p2 = scmp.ne.s32.totalorder %s933_s27, %s732_s13  ;;  %s737_s16 = sshll.u32 %s847_s14, 4  ;;  %s738_s16 = int_to_ptr.vmem [resolvable:$false] %s737_s16 }
  0x22   : > { %s739_s20 = scalar_lea.vmem %s738_s16, 512  ;;  %p740_p11 = scmp.lt.s32.totalorder %s933_s27, %s738_s16 }
  0x23   : > { %p735_p4 = pnand %p733_p2, %p719_p3  ;;  %p741_p5 = scmp.lt.s32.totalorder %s739_s20, %s732_s13 }
  0x25   : > { %p736_p12 = pneg %p735_p4  ;;  %p742_p8 = por %p741_p5, %p740_p11 }
  0x27   : > { %p743_p9 = pnand %p742_p8, %p736_p12 }
  0x29   : > { %746 = shalt.err (!%p743_p9)
}
  0x2a   : > { %641 = dma.hbm_to_vmem [thread:$0]  (!%p929_p13), %s925_s25, 256, %s933_s27, %s88_s29  }
  0x2b   : > { %p1214_p0 = scmp.lt.s32.totalorder %s829_s9, 3  ;;  %p1215_p1 = scmp.ge.s32.totalorder %s829_s9, 1 }
  0x2d   : > { %p105_p3 = pnand %p1215_p1, %p1214_p0 }
  0x2e   : > { %s967_s21 = sand.u32 (!%p105_p3), 1, %s821_s7  }
  0x2f   : > { %108 = sbr.rel (%p105_p3) target bundleno = 732 (0x2dc), region = 24  ;;  %s620_s22 = sshll.u32 (!%p105_p3), %s967_s21, 4 }
  0x30   : > { %s111_s23 = scalar_lea.sflag (!%p105_p3), [#allocation3], %s967_s21  ;;  %s114_s24 = scalar_lea.vmem (!%p105_p3), [#allocation2], %s620_s22 }
  0x36   : > { %808 = dma.done.wait (%p905_p6), %s111_s23, 256  }
  0x37   : > { %810 = vsyncadd (%p905_p6), %s111_s23, 4294967040  ;;  %s621_s25 = sshll.u32 %s967_s21, 3  ;;  %v172_v0 = vlaneseq  ;;  %v133_v5 = vld [vmem:[%s114_s24] ss:$8 sm:$0x3]  ;;  %v848_v17 = vmov 0.0  }
  0x38   : > { %v623_v6 = vld [vmem:[%s114_s24 + $0x2] ss:$8 sm:$0x3]  ;;  %v624_v7 = vld [vmem:[%s114_s24 + $0x3] ss:$8 sm:$0x3] }
  0x39   : > { %v976_v1 = vand.u32 127, %v172_v0  ;;  %v978_v2 = vshrl.u32 %v172_v0, 7  ;;  %v622_v8 = vld [vmem:[%s114_s24 + $0x1] ss:$8 sm:$0x3]  ;;  %v157_v12 = vmul.f32 0.5, %v623_v6 }
  0x3a   : > { %v626_v9 = vld [vmem:[%s114_s24 + $0x5] ss:$8 sm:$0x3]  ;;  %v627_v10 = vld [vmem:[%s114_s24 + $0x6] ss:$8 sm:$0x3] }
  0x3b   : > { %v981_v3 = vadd.s32 128, %v976_v1  ;;  %v984_v4 = vsub.s32 0, %v978_v2  ;;  %v628_v11 = vld [vmem:[%s114_s24 + $0x7] ss:$8 sm:$0x3]  ;;  %vm146_vm0 = vcmp.gt.f32.partialorder %v627_v10, %v626_v9  ;;  %v159_v13 = vmul.f32 0.5, %v624_v7 }
  0x3c   : > { %v987_v14 = vsub.s32 1, %v978_v2  ;;  %v625_v15 = vld [vmem:[%s114_s24 + $0x4] ss:$8 sm:$0x3]  ;;  %v147_v16 = vsel %vm146_vm0, %v627_v10, %v626_v9  ;;  %v148_v18 = vsel %vm146_vm0, 1.0, %v848_v17  ;;  %vm292_vm1 = vcmask 1040384  }
  0x3d   : > { %vm295_vm2 = vcmask 1041408   ;;  %vm151_vm3 = vcmp.gt.f32.partialorder %v628_v11, %v147_v16  ;;  %v158_v19 = vsub.f32 %v133_v5, %v157_v12  ;;  %v160_v20 = vsub.f32 %v622_v8, %v159_v13  ;;  %s1077_s17 = scalar_lea.vmem [#allocation5], %s621_s25  ;;  %s1085_s26 = smov 0  }
  0x3e   : > { %v161_v21 = vadd.f32 %v157_v12, %v133_v5  ;;  %vm298_vm4 = vcmask 1042432   ;;  %v152_v22 = vsel %vm151_vm3, %v628_v11, %v147_v16  ;;  %v153_v23 = vsel %vm151_vm3, 2.0, %v148_v18 }
  0x3f   : > { %v162_v24 = vadd.f32 %v622_v8, %v159_v13  ;;  %vm301_vm5 = vcmask 1043456   ;;  %v154_v25 = vmul.f32 %v625_v15, %v152_v22  ;;  %v163_v26 = vmul.f32 4096.0, %v153_v23 }
  0x40   : > { %v175_v27 = vrot.slane %v158_v19, %v984_v4  ;;  %v179_v28 = vrot.slane %v158_v19, %v987_v14  ;;  %vm304_vm6 = vcmask 1044480   ;;  %v186_v29 = vrot.slane %v160_v20, %v984_v4 }
  0x41   : > { %v190_v30 = vrot.slane %v160_v20, %v987_v14  ;;  %v197_v31 = vrot.slane %v161_v21, %v984_v4  ;;  %v201_v32 = vrot.slane %v161_v21, %v987_v14  ;;  %vm307_vm7 = vcmask 1045504  }
  0x42   : > { %vm155_vm8 = vcmp.gt.f32.partialorder %v154_v25, 0.25  ;;  %v995_v33 = vadd.f32 %v163_v26, %v158_v19  ;;  %v997_v34 = vadd.f32 %v163_v26, %v160_v20  ;;  %v999_v35 = vadd.f32 %v163_v26, %v161_v21 }
  0x43   : > { %vm310_vm9 = vcmask 1046528   ;;  %v156_v36 = vsel %vm155_vm8, %v154_v25, -1.0  ;;  %v1001_v37 = vadd.f32 %v163_v26, %v162_v24  ;;  %v208_v38 = vrot.slane %v162_v24, %v984_v4 }
  0x44   : > { %v212_v39 = vrot.slane %v162_v24, %v987_v14  ;;  %v168_v40 = vsub.f32 %v999_v35, %v995_v33  ;;  %v219_v41 = vrot.slane %v154_v25, %v984_v4  ;;  %v223_v42 = vrot.slane %v154_v25, %v987_v14 }
  0x45   : > { %v230_v43 = vrot.slane %v153_v23, %v984_v4  ;;  %v169_v44 = vsub.f32 %v1001_v37, %v997_v34  ;;  %v234_v45 = vrot.slane %v153_v23, %v987_v14  ;;  %v241_v46 = vrot.slane %v995_v33, %v984_v4 }
  0x46   : > { %v245_v47 = vrot.slane %v995_v33, %v987_v14  ;;  %v252_v48 = vrot.slane %v997_v34, %v984_v4  ;;  %v256_v49 = vrot.slane %v997_v34, %v987_v14  ;;  %v263_v50 = vrot.slane %v999_v35, %v984_v4 }
  0x47   : > { %v267_v51 = vrot.slane %v999_v35, %v987_v14  ;;  %v170_v52 = vmul.f32 %v169_v44, %v168_v40  ;;  %v274_v53 = vrot.slane %v1001_v37, %v984_v4  ;;  %v278_v54 = vrot.slane %v1001_v37, %v987_v14 }
  0x48   : > { %v293_v55 = vsel %vm292_vm1, %v175_v27, %v186_v29  ;;  %v294_v56 = vsel %vm292_vm1, %v179_v28, %v190_v30  ;;  %v313_v58 = vsel %vm292_vm1, %v241_v46, %v252_v48  ;;  %v314_v59 = vsel %vm292_vm1, %v245_v47, %v256_v49 }
  0x49   : > { %v296_v57 = vsel %vm295_vm2, %v293_v55, %v197_v31  ;;  %v1035_v60 = vrot.slane %v170_v52, %v984_v4  ;;  %v1038_v61 = vrot.slane %v170_v52, %v987_v14  ;;  %v297_v62 = vsel %vm295_vm2, %v294_v56, %v201_v32 }
  0x4a   : > { %v299_v63 = vsel %vm298_vm4, %v296_v57, %v208_v38  ;;  %v300_v0 = vsel %vm298_vm4, %v297_v62, %v212_v39  ;;  %v315_v6 = vsel %vm295_vm2, %v313_v58, %v263_v50  ;;  %v316_v7 = vsel %vm295_vm2, %v314_v59, %v267_v51 }
  0x4b   : > { %v302_v5 = vsel %vm301_vm5, %v299_v63, %v219_v41  ;;  %v303_v8 = vsel %vm301_vm5, %v300_v0, %v223_v42  ;;  %v317_v10 = vsel %vm298_vm4, %v315_v6, %v274_v53  ;;  %v318_v11 = vsel %vm298_vm4, %v316_v7, %v278_v54 }
  0x4c   : > { %v305_v9 = vsel %vm304_vm6, %v302_v5, %v230_v43  ;;  %v306_v12 = vsel %vm304_vm6, %v303_v8, %v234_v45  ;;  %v319_v15 = vsel %vm301_vm5, %v317_v10, %v1035_v60  ;;  %v320_v16 = vsel %vm301_vm5, %v318_v11, %v1038_v61 }
  0x4d   : > { %v308_v13 = vsel %vm307_vm7, %v305_v9, 0.0  ;;  %v309_v17 = vsel %vm307_vm7, %v306_v12, 0.0  ;;  %v321_v19 = vsel %vm304_vm6, %v319_v15, 0.0  ;;  %v322_v20 = vsel %vm304_vm6, %v320_v16, 0.0 }
  0x4e   : > { %v1058_v18 = vsel %vm310_vm9, %v308_v13, 0.0  ;;  %v1063_v21 = vsel %vm310_vm9, %v309_v17, 0.0  ;;  %v323_v22 = vsel %vm307_vm7, %v321_v19, 0.0  ;;  %v324_v23 = vsel %vm307_vm7, %v322_v20, 0.0 }
  0x4f   : > { %v334_v24 = vrot.slane %v156_v36, %v984_v4   ;;  %v1069_v25 = vsel %vm310_vm9, %v323_v22, 0.0  ;;  %v1072_v26 = vsel %vm310_vm9, %v324_v23, 0.0  ;;  %v338_v27 = vrot.slane %v156_v36, %v987_v14  }
  0x50   : > { %v1079_v28 = vmov 0.0  }
  0x51 LB: >> { %v350_v29 = vsel %vm292_vm1, %v841_v24, -inf  ;;  %v351_v30 = vsel %vm292_vm1, %v837_v27, -inf  ;;  %v849_v53 = vmov 0   ;;  %v405_v9 = vsub.s32 2, %v978_v2  ;;  %s845_s26 = sphi %s1085_s26, %s346_s26   ;;  %v841_v24 = vphi %v334_v24, %v502_v24   ;;  %v837_v27 = vphi %v338_v27, %v503_v27   ;;  %v833_v28 = vphi %v1079_v28, %v1216_v28  }
  0x52   : >> { %v352_v31 = vmax.f32 %v350_v29, %v351_v30  ;;  %v419_v10 = vsub.s32 3, %v978_v2  ;;  %v510_v11 = vstv %s845_s26  ;;  %s346_s26 = sadd.s32 1, %s845_s26  }
  0x53   : >> { %vm511_vm4 = vcmp.eq.s32.totalorder %v976_v1, %v510_v11  ;;  %p343_p6 = scmp.ge.s32.totalorder %s346_s26, 32  }
  0x54   : >> { %353 = vmax.xlane.f32.xlu0 %v352_v31  ;;  %s630_s27 = sshll.u32 (%p343_p6), %s883_s10, 7  ;;  %s529_s2 = sshll.u32 (%p343_p6), %s1077_s17, 4  ;;  %s530_s2 = int_to_ptr.vmem [resolvable:$true] %s529_s2 }
  0x55   : > { %s1167_s30 = scalar_lea.hbm (%p343_p6), %s1207_s1, %s630_s27  ;;  %s516_s3 = scalar_lea.sflag (%p343_p6), [#allocation4], %s967_s21 }
  0x56   : > { %s747_s4 = scalar_lea.vmem (%p343_p6), %s530_s2, 128  ;;  %p1217_p12 = scmp.ne.s32.totalorder (%p343_p6), %s1211_s18, 0 }
  0x57   : > { %p748_p11 = scmp.ne.s32.totalorder (%p343_p6), %s530_s2, %s747_s4  ;;  %s851_s5 = smov (%p343_p6), [#allocation5]  }
  0x58   : > { %s751_s11 = sshll.u32 (%p343_p6), %s851_s5, 4  ;;  %s752_s11 = int_to_ptr.vmem [resolvable:$false] %s751_s11 }
  0x59   : > { %p749_p13 = pnand (%p343_p6), %p748_p11, %p1217_p12  ;;  %s753_s13 = scalar_lea.vmem (%p343_p6), %s752_s11, 256 }
  0x5a   : > { %p754_p10 = scmp.lt.s32.totalorder (%p343_p6), %s530_s2, %s752_s11  ;;  %p755_p2 = scmp.lt.s32.totalorder (%p343_p6), %s753_s13, %s747_s4 }
  0x5b   : > { %p750_p7 = pneg (%p343_p6), %p749_p13 }
  0x5c   : > { %p756_p4 = por (%p343_p6), %p755_p2, %p754_p10 }
  0x5e   : > { %p757_p5 = pnand (%p343_p6), %p756_p4, %p750_p7 }
  0xe1   : >> { %v1103_v32 = vpop.xlane.xlu0 %353 }
  0xe2   : >> { %vm356_vm10 = vcmp.eq.f32.partialorder %v841_v24, %v1103_v32  ;;  %vm357_vm11 = vcmp.eq.f32.partialorder %v837_v27, %v1103_v32  ;;  %vm355_vm3 = vcmp.gt.f32.partialorder %v1103_v32, 0.0 }
  0xe3   : >> { %v358_v36 = vsel %vm356_vm10, %v976_v1, 256  ;;  %v359_v38 = vsel %vm357_vm11, %v981_v3, 256  ;;  %v487_v7 = vsel %vm355_vm3, 1, %v849_v53 }
  0xe4   : >> { %v360_v39 = vsel %vm292_vm1, %v358_v36, 2147483647  ;;  %v361_v40 = vsel %vm292_vm1, %v359_v38, 2147483647  ;;  %v507_v8 = vrot.slane %v487_v7, %v984_v4 }
  0xe5   : >> { %vm362_vm12 = vcmp.lt.s32.totalorder %v360_v39, %v361_v40 }
  0xe6   : >> { %v363_v41 = vsel %vm362_vm12, %v360_v39, %v361_v40  ;;  %vm508_vm5 = vcmp.eq.s32.totalorder %v507_v8, 1 }
  0xe7   : >> { %v365_v42 = vshra.s32 %v363_v41, 16  ;;  %v364_v44 = vand.u32 65535, %v363_v41  ;;  %v850_v41 = vmov 1966171168  }
  0xe9   : >> { %v367_v43 = vcvt.s32.f32 %v365_v42  ;;  %v366_v46 = vcvt.s32.f32 %v364_v44  ;;  %v453_v42 = vunpack.c.l.s4 %v850_v41 }
  0xeb   : >> { %368 = vmin.xlane.f32.xlu0 %v367_v43 }
 0x178   : >> { %v369_v45 = vpop.xlane.xlu0 %368 }
 0x179   : >> { %vm370_vm13 = vcmp.eq.f32.partialorder %v367_v43, %v369_v45  ;;  %v375_v48 = vcvt.f32.s32 %v369_v45 }
 0x17a   : >> { %v371_v47 = vsel %vm370_vm13, %v366_v46, inf  ;;  %vm513_vm13 = vcmask (%p343_p6), 261120  }
 0x17b   : >> { %372 = vmin.xlane.f32.xlu1 %v371_v47  ;;  %v376_v50 = vshll.u32 %v375_v48, 16  ;;  %v454_v48 = vunpack.c.0.s8 %v453_v42 }
 0x208   : >> { %v373_v49 = vpop.xlane.xlu1 %372 }
 0x209   : >> { %v374_v51 = vcvt.f32.s32 %v373_v49 }
 0x20b   : >> { %v377_v52 = vadd.s32 %v376_v50, %v374_v51 }
 0x20d   : >> { %vm378_vm14 = vcmp.eq.s32.totalorder %v976_v1, %v377_v52  ;;  %vm379_vm15 = vcmp.eq.s32.totalorder %v981_v3, %v377_v52  ;;  %v457_v52 = vsub.s32 %v454_v48, %v978_v2 }
 0x20e   : >> { %v380_v54 = vsel %vm378_vm14, 1, %v849_v53  ;;  %v381_v55 = vsel %vm379_vm15, 1, %v849_v53 }
 0x20f   : >> { %v385_v56 = vrot.slane %v380_v54, %v984_v4  ;;  %v389_v57 = vrot.slane %v381_v55, %v984_v4  ;;  %v470_v58 = vcombine.low %v380_v54, %v381_v55 }
 0x211   : >> { %vm390_vm0 = vcmp.eq.s32.totalorder %v385_v56, 1  ;;  %vm391_vm2 = vcmp.eq.s32.totalorder %v389_v57, 1  ;;  %v477_v57 = vrot.slane %v470_v58, %v457_v52 }
 0x212   : >> { %v394_v59 = vsel %vm390_vm0, %v1069_v25, 0.0  ;;  %v395_v62 = vsel %vm391_vm2, %v1072_v26, 0.0  ;;  %v392_v63 = vsel %vm390_vm0, %v1058_v18, 0.0  ;;  %v393_v0 = vsel %vm391_vm2, %v1063_v21, 0.0 }
 0x213   : >> { %v399_v5 = vadd.f32 %v395_v62, %v394_v59  ;;  %v396_v6 = vadd.f32 %v393_v0, %v392_v63  ;;  %v484_v59 = vrot.slane %v477_v57, %v457_v52 }
 0x215   : >> { %400 = vadd.xlane.f32.xlu1 %v399_v5  ;;  %397 = vadd.xlane.f32.xlu0 %v396_v6  ;;  %vm485_vm6 = vcmp.ne.s32.totalorder %v484_v59, 0 }
 0x2a2   : >> { %v401_v12 = vpop.xlane.xlu1 %400  ;;  %v398_v13 = vpop.xlane.xlu0 %397 }
 0x2a3   : >> { %v406_v15 = vrot.slane %v401_v12, %v405_v9  ;;  %v412_v16 = vrot.slane %v401_v12, %v984_v4  ;;  %v420_v17 = vrot.slane %v401_v12, %v419_v10  ;;  %v426_v19 = vrot.slane %v401_v12, %v987_v14 }
 0x2a4   : >> { %v509_v20 = vsel %vm508_vm5, %v398_v13, 0.0  ;;  %v432_v44 = vadd.f32 %v401_v12, %v1035_v60  ;;  %v433_v45 = vadd.f32 %v401_v12, %v1038_v61 }
 0x2a5   : >> { %v408_v22 = vmin.f32 %v999_v35, %v406_v15  ;;  %v414_v23 = vmax.f32 %v995_v33, %v412_v16  ;;  %v422_v29 = vmin.f32 %v1001_v37, %v420_v17  ;;  %v428_v30 = vmax.f32 %v997_v34, %v426_v19 }
 0x2a6   : >> { %v512_v31 = vsel %vm511_vm4, %v509_v20, %v833_v28  }
 0x2a7   : >> { %v415_v36 = vsub.f32 %v408_v22, %v414_v23  ;;  %v429_v38 = vsub.f32 %v422_v29, %v428_v30  ;;  %514 = vst.msk [vmem:[%s1077_s17] sm:$0xff] (%p343_p6), %vm513_vm13, %v512_v31 }
 0x2a9   : >> { %v416_v39 = vmax.f32 %v415_v36, 0.0  ;;  %v430_v40 = vmax.f32 %v429_v38, 0.0 }
 0x2ab   : >> { %v431_v43 = vmul.f32 %v430_v40, %v416_v39 }
 0x2ad   : >> { %v438_v46 = vrot.slane %v431_v43, %v984_v4  ;;  %v442_v47 = vrot.slane %v431_v43, %v987_v14 }
 0x2af   : >> { %v445_v49 = vsub.f32 %v432_v44, %v438_v46  ;;  %v446_v50 = vsub.f32 %v433_v45, %v442_v47 }
 0x2b1   : >> { %v447_v51 = vmax.f32 %v445_v49, 1e-09  ;;  %v448_v28 = vmax.f32 %v446_v50, 1e-09 }
 0x2b3   : >> { %v451_v54 = vcombine.high %v447_v51, %v448_v28  ;;  %v1216_v28 = vmov %v512_v31 }
 0x2b5   : >> { %v458_v55 = vrot.slane %v451_v54, %v457_v52 }
 0x2b7   : >> { %v465_v56 = vrot.slane %v458_v55, %v457_v52 }
 0x2b9   : >> { %715 = vrcp.f32 %v465_v56 }
 0x2c3   : >> { %v716_v62 = vpop.eup %715 }
 0x2c4   : >> { %v468_v63 = vmul.f32 %v716_v62, %v431_v43 }
 0x2c6   : >> { %vm469_vm7 = vcmp.gt.f32.partialorder %v468_v63, 0.45 }
 0x2c7   : >> { %vm486_vm8 = vmor %vm469_vm7, %vm485_vm6 }
 0x2c8   : >> { %v489_v0 = vsel %vm486_vm8, 1, %v849_v53  ;;  %345 = sbr.rel (!%p343_p6) target bundleno = 81 (0x51), region = 83 }
 0x2c9   : >> { %v493_v5 = vrot.slane %v489_v0, %v984_v4  ;;  %v497_v6 = vrot.slane %v489_v0, %v987_v14 }
 0x2cb   : >> { %vm498_vm9 = vcmp.ne.s32.totalorder %v493_v5, 0  ;;  %vm499_vm10 = vcmp.ne.s32.totalorder %v497_v6, 0 }
 0x2cc   : >> { %vm500_vm11 = vmand %vm355_vm3, %vm498_vm9 }
 0x2cd   : >> { %vm501_vm12 = vmand %vm355_vm3, %vm499_vm10  ;;  %v502_v24 = vsel %vm500_vm11, -1.0, %v841_v24  }
 0x2ce   : >> { %v503_v27 = vsel %vm501_vm12, -1.0, %v837_v27  }
 0x2cf   : > { %760 = shalt.err (!%p757_p5)
}
 0x2d0   : > { %s761_s10 = scalar_lea.hbm %s1167_s30, 128  ;;  %s765_s20 = scalar_lea.hbm %s1207_s1, 256 }
 0x2d1   : > { %p762_p8 = scmp.ne.s32.totalorder %s1167_s30, %s761_s10  ;;  %p766_p1 = scmp.lt.u32.totalorder %s1167_s30, %s1207_s1 }
 0x2d2   : > { %p767_p3 = scmp.lt.u32.totalorder %s765_s20, %s761_s10  ;;  %p769_p11 = scmp.lt.u32.totalorder %s761_s10, %s1167_s30 }
 0x2d3   : > { %p763_p9 = pnand %p762_p8, %p1217_p12 }
 0x2d4   : > { %p768_p6 = por %p767_p3, %p766_p1 }
 0x2d5   : > { %p764_p0 = pneg %p763_p9 }
 0x2d6   : > { %p770_p13 = por %p769_p11, %p768_p6 }
 0x2d8   : > { %p771_p7 = pnand %p770_p13, %p764_p0 }
 0x2da   : > { %774 = shalt.err (!%p771_p7)
}
 0x2db   : > { %636 = dma.vmem_to_hbm [thread:$0]  (%p1217_p12), %s530_s2, 128, %s1167_s30, %s516_s3  }
 0x2dc PF: > { %s541_s23 = sand.u32 1, %s817_s6   ;;  %p1218_p10 = scmp.ne.s32.totalorder %s1212_s19, 0 }
 0x2dd   : > { %p1219_p2 = scmp.ge.s32.totalorder %s829_s9, 2  ;;  %s542_s24 = scalar_lea.sflag [#allocation4], %s541_s23 }
 0x2df   : > { %p643_p4 = pnand %p1219_p2, %p1218_p10 }
 0x2e1   : > { %812 = dma.done.wait (!%p643_p4), %s542_s24, 128  }
 0x2e2   : > { %814 = vsyncadd (!%p643_p4), %s542_s24, 4294967168  ;;  %p14_p5 = scmp.ge.s32.totalorder %s887_s12, 4   ;;  %s1220_s6 = smov %s821_s7 }
 0x2e3   : > { %s1221_s7 = smov %s825_s8  ;;  %s1222_s8 = smov %s899_s15 }
 0x2e4   : > { %s1223_s9 = smov %s887_s12  ;;  %16 = sbr.rel (!%p14_p5) target bundleno = 5 (0x5), region = 94 }
 0x2eb   :  { %547 = vsyncpa [#allocation3], 1 }
 0x2ec   :  { %549 = vsyncpa [#allocation3 + $0x1], 1 }
 0x2ed   :  { %550 = vsyncpa [#allocation4], 1 }
 0x2ee   :  { %552 = vsyncpa [#allocation4 + $0x1], 1 }

</bundles_post_ra>
